<compile_context>
chip_gen: v6e
topology: v6e:2x2x1
jax: 0.10.0
libtpu: 0.0.40
codegen_flags: <defaults>
</compile_context>

<pallas_src>
import functools

import jax
import jax.numpy as jnp
from jax.experimental import pallas as pl
from jax.experimental.pallas import tpu as pltpu


def _vmem_budget_bytes():
    """~3/4 of physical VMEM when discoverable, else 48 MiB (fits v7x's 64 MiB)."""
    try:
        cap = getattr(pltpu.get_tpu_info(), "vmem_capacity_bytes", None)
        if cap:
            return max(32 * 1024 * 1024, int(cap) * 3 // 4)
    except Exception:
        pass
    return 48 * 1024 * 1024


def _conv1d_kernel(*refs, win, c_in_pad, l_out_tile, has_halo):
    # Tiled path refs : x_main, x_halo, w, b, out, join-scratch
    # Untiled path    : x_full, w, b, out
    if has_halo:
        x_ref, xh_ref, w_ref, b_ref, o_ref, xw_ref = refs
        l_main = x_ref.shape[-1]
        halo_w = xh_ref.shape[-1]
        # Join main tile + halo ONCE into a single VMEM window (one extra pass
        # over the input tile) so each tap below is a plain VMEM read -- no
        # win x C_in im2col slab through the store slot.
        xw_ref[:, pl.ds(0, l_main)] = x_ref[...]
        xw_ref[:, pl.ds(l_main, halo_w)] = xh_ref[...]
        window = xw_ref
    else:
        x_ref, w_ref, b_ref, o_ref = refs
        window = x_ref

    # Per-tap accumulating MXU matmuls (f32 accumulation).  Slice starts are
    # static; the lane-misaligned loads for k>0 lower to shifted loads (XLU),
    # not extra vst traffic.
    acc = None
    for k in range(win):
        w_k = w_ref[:, pl.ds(k * c_in_pad, c_in_pad)]        # (tile_co, C_in_pad)
        x_k = window[:, pl.ds(k, l_out_tile)]                # (C_in_pad, L_tile)
        part = jnp.dot(w_k, x_k, preferred_element_type=jnp.float32)
        acc = part if acc is None else acc + part

    # Bias folded into the single epilogue pass.
    o_ref[...] = (acc + b_ref[...]).astype(o_ref.dtype)


def conv1d_pallas(x, weight, bias, *, l_tile=1024, tile_co=256, compute_dtype=None):
    """Conv1d forward, NCL in / NCL out (matches torch.nn.Conv1d defaults).

    x: (N, C_in, L); weight: (C_out, C_in, win); bias: (C_out,).
    """
    n, c_in, l = x.shape
    c_out, c_in_w, win = weight.shape
    assert c_in_w == c_in
    l_out = l - win + 1
    assert l_out >= 1, "sequence shorter than the conv window"
    out_dtype = x.dtype

    # Sublane-pack the channel (contraction) dim for the dtype fed to the MXU:
    # 8 for f32, 16 for bf16 (review: bf16 needs 16 to avoid sublane repacks).
    mxu_dtype = jnp.dtype(compute_dtype) if compute_dtype is not None else jnp.dtype(x.dtype)
    pad_mult = max(8, 32 // max(1, mxu_dtype.itemsize))
    c_in_pad = pl.cdiv(c_in, pad_mult) * pad_mult
    if c_in_pad != c_in:
        x = jnp.pad(x, ((0, 0), (0, c_in_pad - c_in), (0, 0)))
        weight = jnp.pad(weight, ((0, 0), (0, c_in_pad - c_in), (0, 0)))

    # Flatten taps into the contraction dim: column index = k*C_in_pad + ci.
    w2d = jnp.transpose(weight, (0, 2, 1)).reshape(c_out, win * c_in_pad)
    b2d = bias.reshape(c_out, 1).astype(jnp.float32)
    if compute_dtype is not None:
        x = x.astype(compute_dtype)          # halves HBM bytes for bf16
        w2d = w2d.astype(compute_dtype)

    x_isz = jnp.dtype(x.dtype).itemsize
    o_isz = jnp.dtype(out_dtype).itemsize

    # ---- C_out tiling -------------------------------------------------------
    if c_out <= tile_co:
        tile_co = c_out
    else:
        tile_co = max(8, (tile_co // 8) * 8)

    # ---- L (halo) tiling ----------------------------------------------------
    budget = _vmem_budget_bytes()
    halo_w = 128 * max(1, pl.cdiv(win - 1, 128))   # lane-aligned halo block width

    def vmem_estimate(l_out_t, l_in_t, use_halo, tco):
        est = 2 * c_in_pad * l_in_t * x_isz              # x main tile (double buffered)
        est += 2 * tco * win * c_in_pad * x_isz          # weights
        est += 2 * tco * 4                               # bias
        est += 2 * tco * l_out_t * o_isz                 # output tile
        est += tco * l_out_t * 4                         # f32 accumulator temp
        if use_halo:
            est += 2 * c_in_pad * halo_w * x_isz         # halo tile
            est += c_in_pad * (l_out_t + halo_w) * x_isz # join scratch
        return est + (2 << 20)                           # Mosaic internal slack

    l_tile_eff = max(128, (min(l_tile, l_out) // 128) * 128)
    l_tile_eff = max(halo_w, (l_tile_eff // halo_w) * halo_w)
    tiled_l = l_out > l_tile_eff
    if (not tiled_l and l_out > 2 * halo_w
            and vmem_estimate(l_out, l, False, tile_co) > budget):
        # Full-L residency would blow VMEM (v7x: 64 MiB) -> force halo tiling.
        tiled_l = True
        l_tile_eff = max(halo_w, (l_out // 2 // halo_w) * halo_w)

    if tiled_l:
        has_halo = win > 1
        while (vmem_estimate(l_tile_eff, l_tile_eff, has_halo, tile_co) > budget
               and l_tile_eff > halo_w):
            l_tile_eff = max(halo_w, (l_tile_eff // 2 // halo_w) * halo_w)
        while (vmem_estimate(l_tile_eff, l_tile_eff, has_halo, tile_co) > budget
               and tile_co > 8):
            tile_co = max(8, (tile_co // 2 // 8) * 8)
        l_out_tile = l_in_tile = l_tile_eff
    else:
        has_halo = False
        while vmem_estimate(l_out, l, False, tile_co) > budget and tile_co > 8:
            tile_co = max(8, (tile_co // 2 // 8) * 8)
        l_out_tile, l_in_tile = l_out, l

    n_l = pl.cdiv(l_out, l_out_tile)
    n_co = pl.cdiv(c_out, tile_co)

    # ---- Grid order: keep the bigger operand resident ------------------------
    x_total = n * c_in_pad * l * x_isz
    w_total = c_out * win * c_in_pad * x_isz
    #  x-resident: grid (b, lt, co) -> every x tile fetched once, weights
    #              re-fetched n*n_l times.
    #  w-resident: grid (co, b, lt) -> weights fetched once, x re-streamed n_co
    #              times.  Pick whichever moves fewer HBM bytes.
    x_resident = (x_total + n * n_l * w_total) <= (n_co * x_total + w_total)

    def _x_map(b, lt, co):
        return (b, 0, lt)

    def _h_map(b, lt, co):
        r = l_in_tile // halo_w
        return (b, 0, jnp.minimum((lt + 1) * r, pl.cdiv(l, halo_w) - 1))

    def _w_map(b, lt, co):
        return (co, 0)

    def _o_map(b, lt, co):
        return (b, co, lt)

    if x_resident:
        grid = (n, n_l, n_co)
        reorder = lambda f: f                                   # args already (b, lt, co)
    else:
        grid = (n_co, n, n_l)
        reorder = lambda f: (lambda co, b, lt: f(b, lt, co))

    in_specs = [pl.BlockSpec((None, c_in_pad, l_in_tile), reorder(_x_map))]
    operands = [x]
    if has_halo:
        in_specs.append(pl.BlockSpec((None, c_in_pad, halo_w), reorder(_h_map)))
        operands.append(x)                                      # same array, halo view
    in_specs += [
        pl.BlockSpec((tile_co, win * c_in_pad), reorder(_w_map)),
        pl.BlockSpec((tile_co, 1), reorder(_w_map)),
    ]
    operands += [w2d, b2d]

    out_spec = pl.BlockSpec((None, tile_co, l_out_tile), reorder(_o_map))
    scratch = ([pltpu.VMEM((c_in_pad, l_in_tile + halo_w), x.dtype)]
               if has_halo else [])

    kernel = functools.partial(
        _conv1d_kernel, win=win, c_in_pad=c_in_pad,
        l_out_tile=l_out_tile, has_halo=has_halo)

    out = pl.pallas_call(
        kernel,
        out_shape=jax.ShapeDtypeStruct((n, c_out, l_out), out_dtype),
        grid_spec=pltpu.PrefetchScalarGridSpec(
            num_scalar_prefetch=0,
            grid=grid,
            in_specs=in_specs,
            out_specs=out_spec,
            scratch_shapes=scratch),
        compiler_params=pltpu.CompilerParams(
            dimension_semantics=("parallel", "parallel", "parallel"),
            vmem_limit_bytes=int(budget)),
    )(*operands)
    return out


def conv1d_reference(x_ncl, weight, bias):
    out = jax.lax.conv_general_dilated(
        x_ncl, weight, window_strides=(1,), padding="VALID",
        dimension_numbers=("NCH", "OIH", "NCH"))
    return out + bias[None, :, None]


if __name__ == "__main__":
    # Small shapes consistent with Conv1d(ch_in, ch_out, win)
    N, CH_IN, CH_OUT, L, WIN = 2, 4, 8, 16, 3

    key = jax.random.PRNGKey(0)
    kx, kw, kb = jax.random.split(key, 3)

    x = jax.random.normal(kx, (N, CH_IN, L), dtype=jnp.float32)
    bound = 1.0 / (CH_IN * WIN) ** 0.5
    weight = jax.random.uniform(kw, (CH_OUT, CH_IN, WIN), jnp.float32,
                                minval=-bound, maxval=bound)
    bias = jax.random.uniform(kb, (CH_OUT,), jnp.float32,
                              minval=-bound, maxval=bound)

    out = conv1d_pallas(x, weight, bias)
    out = jax.block_until_ready(out)

    ref = conv1d_reference(x, weight, bias)
    assert out.shape == (N, CH_OUT, L - WIN + 1), out.shape
    assert jnp.allclose(out, ref, atol=1e-5, rtol=1e-5), "mismatch vs reference"

    print("KERNEL_OK")
</pallas_src>

<mosaic_0001>
module attributes {stable_mosaic.version = 11 : i64} {
  func.func @_conv1d_kernel(%arg0: i32, %arg1: i32, %arg2: i32, %arg3: memref<1x8x16xf32, #tpu.memory_space<vmem>>, %arg4: memref<8x24xf32, #tpu.memory_space<vmem>>, %arg5: memref<8x1xf32, #tpu.memory_space<vmem>>, %arg6: memref<1x8x14xf32, #tpu.memory_space<vmem>>) attributes {dimension_semantics = [#tpu.dimension_semantics<parallel>, #tpu.dimension_semantics<parallel>, #tpu.dimension_semantics<parallel>], iteration_bounds = array<i64: 1, 2, 1>, scalar_prefetch = 0 : i64, scratch_operands = 0 : i64, tpu.core_type = #tpu.core_type<tc>, window_params = [{transform_indices = @transform_0, window_bounds = array<i64: 1, 8, 16>}, {transform_indices = @transform_1, window_bounds = array<i64: 8, 24>}, {transform_indices = @transform_2, window_bounds = array<i64: 8, 1>}, {transform_indices = @transform_3, window_bounds = array<i64: 1, 8, 14>}]} {
    %c0 = arith.constant 0 : index
    %c0_0 = arith.constant 0 : index
    %0 = vector.load %arg4[%c0, %c0_0] : memref<8x24xf32, #tpu.memory_space<vmem>>, vector<8x8xf32>
    %c0_1 = arith.constant 0 : index
    %c0_2 = arith.constant 0 : index
    %c0_3 = arith.constant 0 : index
    %1 = vector.load %arg3[%c0_1, %c0_2, %c0_3] : memref<1x8x16xf32, #tpu.memory_space<vmem>>, vector<1x8x14xf32>
    %2 = vector.shape_cast %1 : vector<1x8x14xf32> to vector<8x14xf32>
    %cst = arith.constant dense<0.000000e+00> : vector<8x14xf32>
    %3 = tpu.matmul %0, %2, %cst {dimension_numbers = #tpu.dot_dimension_numbers<[1], [0], [0], [1], [0, 0, 1, 1], [], []>} : vector<8x8xf32>, vector<8x14xf32>, vector<8x14xf32> -> vector<8x14xf32>
    %c0_4 = arith.constant 0 : index
    %c8 = arith.constant 8 : index
    %4 = vector.load %arg4[%c0_4, %c8] : memref<8x24xf32, #tpu.memory_space<vmem>>, vector<8x8xf32>
    %c0_5 = arith.constant 0 : index
    %c0_6 = arith.constant 0 : index
    %c1 = arith.constant 1 : index
    %5 = vector.load %arg3[%c0_5, %c0_6, %c1] : memref<1x8x16xf32, #tpu.memory_space<vmem>>, vector<1x8x14xf32>
    %6 = vector.shape_cast %5 : vector<1x8x14xf32> to vector<8x14xf32>
    %cst_7 = arith.constant dense<0.000000e+00> : vector<8x14xf32>
    %7 = tpu.matmul %4, %6, %cst_7 {dimension_numbers = #tpu.dot_dimension_numbers<[1], [0], [0], [1], [0, 0, 1, 1], [], []>} : vector<8x8xf32>, vector<8x14xf32>, vector<8x14xf32> -> vector<8x14xf32>
    %8 = arith.addf %3, %7 : vector<8x14xf32>
    %c0_8 = arith.constant 0 : index
    %c16 = arith.constant 16 : index
    %9 = vector.load %arg4[%c0_8, %c16] : memref<8x24xf32, #tpu.memory_space<vmem>>, vector<8x8xf32>
    %c0_9 = arith.constant 0 : index
    %c0_10 = arith.constant 0 : index
    %c2 = arith.constant 2 : index
    %10 = vector.load %arg3[%c0_9, %c0_10, %c2] : memref<1x8x16xf32, #tpu.memory_space<vmem>>, vector<1x8x14xf32>
    %11 = vector.shape_cast %10 : vector<1x8x14xf32> to vector<8x14xf32>
    %cst_11 = arith.constant dense<0.000000e+00> : vector<8x14xf32>
    %12 = tpu.matmul %9, %11, %cst_11 {dimension_numbers = #tpu.dot_dimension_numbers<[1], [0], [0], [1], [0, 0, 1, 1], [], []>} : vector<8x8xf32>, vector<8x14xf32>, vector<8x14xf32> -> vector<8x14xf32>
    %13 = arith.addf %8, %12 : vector<8x14xf32>
    %c0_12 = arith.constant 0 : index
    %c0_13 = arith.constant 0 : index
    %14 = vector.load %arg5[%c0_12, %c0_13] : memref<8x1xf32, #tpu.memory_space<vmem>>, vector<8x1xf32>
    %15 = vector.broadcast %14 : vector<8x1xf32> to vector<8x14xf32>
    %16 = arith.addf %13, %15 : vector<8x14xf32>
    %c0_14 = arith.constant 0 : index
    %c0_15 = arith.constant 0 : index
    %c0_16 = arith.constant 0 : index
    %17 = vector.load %arg6[%c0_14, %c0_15, %c0_16] : memref<1x8x14xf32, #tpu.memory_space<vmem>>, vector<1x8x14xf32>
    %18 = vector.shape_cast %17 : vector<1x8x14xf32> to vector<8x14xf32>
    %19 = vector.shape_cast %16 : vector<8x14xf32> to vector<1x8x14xf32>
    tpu.vector_store %arg6[%c0_14, %c0_15, %c0_16], %19 {strides = array<i32>} : memref<1x8x14xf32, #tpu.memory_space<vmem>>, vector<1x8x14xf32>,
    return
  }
  func.func @transform_0(%arg0: i32, %arg1: i32, %arg2: i32) -> (i32, i32, i32) {
    %c0_i32 = arith.constant 0 : i32
    %c0_i32_0 = arith.constant 0 : i32
    return %arg1, %c0_i32, %arg2 : i32, i32, i32
  }
  func.func @transform_1(%arg0: i32, %arg1: i32, %arg2: i32) -> (i32, i32) {
    %c0_i32 = arith.constant 0 : i32
    %c0_i32_0 = arith.constant 0 : i32
    return %arg0, %c0_i32 : i32, i32
  }
  func.func @transform_2(%arg0: i32, %arg1: i32, %arg2: i32) -> (i32, i32) {
    %c0_i32 = arith.constant 0 : i32
    %c0_i32_0 = arith.constant 0 : i32
    return %arg0, %c0_i32 : i32, i32
  }
  func.func @transform_3(%arg0: i32, %arg1: i32, %arg2: i32) -> (i32, i32, i32) {
    %c0_i32 = arith.constant 0 : i32
    return %arg1, %arg0, %arg2 : i32, i32, i32
  }
}

</mosaic_0001>

<bundles_post_ra>
// kernel: tpu_custom_call.1
= control target key start
LH: loop header
LB: loop body
LE: loop exit
PB: predicated region body
PF: predicated region fallthrough
CT: control target
= control target key end

     0   :  { %8 = vsyncpa [#allocation3], 0  ;;  %s1015_s0 = inlined_call_operand.hbm [shape: f32[2,8,16], index: 0, kind: input, shape index: {}]   ;;  %s1016_s1 = inlined_call_operand.vmem [shape: f32[8,24], index: 1, kind: input, shape index: {}]   ;;  %s1017_s2 = inlined_call_operand.vmem [shape: f32[8,1], index: 2, kind: input, shape index: {}]   ;;  %s1018_s3 = inlined_call_operand.hbm [shape: f32[2,8,14], index: 3, kind: output, shape index: {}]  }
   0x1   :  { %10 = vsyncpa [#allocation3 + $0x1], 0 }
   0x2   :  { %11 = vsyncpa [#allocation4], 0 }
   0x3   :  { %13 = vsyncpa [#allocation4 + $0x1], 0  ;;  %s865_s12 = smov 0   ;;  %s867_s13 = smov 0  }
   0x4   :  { %s869_s14 = smov 0   ;;  %s871_s15 = smov 0  }
   0x5   :  { %s873_s16 = smov 0   ;;  %s875_s17 = smov 0  }
   0x6 LB: > { %s617_s18 = sadd.s32 4294967295, %s834_s17   ;;  %s618_s19 = sadd.s32 4294967294, %s834_s17   ;;  %s834_s17 = sphi %s875_s17, %s19_s17   ;;  %s830_s16 = sphi %s873_s16, %s1030_s16   ;;  %s826_s15 = sphi %s871_s15, %s1029_s15   ;;  %s822_s14 = sphi %s869_s14, %s1028_s14   ;;  %s818_s13 = sphi %s867_s13, %s1027_s13   ;;  %s814_s12 = sphi %s865_s12, %s1026_s12  }
   0x7   : > { %s34_s20 = sadd.s32 1, %s830_s16  ;;  %s47_s21 = sadd.s32 1, %s822_s14 }
   0x8   : > { %p36_p0 = scmp.ge.s32.totalorder %s34_s20, 2  ;;  %p54_p1 = scmp.ne.s32.totalorder %s822_s14, %s818_s13 }
   0x9   : > { %p55_p2 = scmp.eq.s32.totalorder %s834_s17, 0  ;;  %p60_p3 = scmp.ne.s32.totalorder %s818_s13, %s814_s12 }
   0xa   : > { %s1032_s20 = smov (%p36_p0, %s34_s20), 0  ;;  %p61_p5 = scmp.eq.s32.totalorder %s617_s18, 0 }
   0xb   : > { %p906_p4 = por %p55_p2, %p54_p1  ;;  %s42_s23 = ssub.s32 %s830_s16, %s1032_s20 }
   0xc   : > { %p140_p6 = scmp.eq.s32.totalorder %s617_s18, 1  ;;  %p45_p7 = scmp.eq.s32.totalorder %s42_s23, 0 }
   0xd   : > { %p912_p8 = por %p61_p5, %p60_p3  ;;  %p146_p10 = scmp.eq.s32.totalorder %s618_s19, 1 }
   0xe   : > { %p916_p9 = por %p140_p6, %p54_p1  ;;  %p668_p13 = scmp.lt.s32.totalorder %s834_s17, 2 }
   0xf   : > { %s921_s26 = scalar_select %p45_p7, %s822_s14, %s47_s21  }
  0x10   : > { %p923_p11 = por %p146_p10, %p60_p3  ;;  %s180_s28 = sand.u32 1, %s822_s14  }
  0x11   : > { %s623_s29 = sshll.u32 %s180_s28, 3  ;;  %s624_s30 = sshll.u32 %s830_s16, 7 }
  0x12   : > { %s1022_s27 = scalar_select %p923_p11, 1, 0 }
  0x13   : > { %s190_s6 = scalar_lea.hbm %s1015_s0, %s624_s30  ;;  %s184_s7 = scalar_lea.vmem [#allocation2], %s623_s29 }
  0x14   : > { %s192_s8 = sshll.u32 %s184_s7, 4  ;;  %p936_p0 = pnand %p668_p13, %p906_p4  ;;  %s193_s8 = int_to_ptr.vmem [resolvable:$true] %s192_s8 }
  0x15   : > { %p625_p1 = scmp.ge.s32.totalorder %s834_s17, 1  ;;  %p197_p2 = scmp.lt.s32.totalorder %s834_s17, 3 }
  0x16   : > { %s181_s10 = scalar_lea.sflag [#allocation3], %s180_s28  ;;  %p728_p3 = pneg %p936_p0 }
  0x17   : > { %s739_s11 = scalar_lea.vmem %s193_s8, 128  ;;  %s836_s18 = smov [#allocation2]  }
  0x18   : > { %p740_p5 = scmp.ne.s32.totalorder %s193_s8, %s739_s11  ;;  %s744_s19 = sshll.u32 %s836_s18, 4  ;;  %s745_s19 = int_to_ptr.vmem [resolvable:$false] %s744_s19 }
  0x19   : > { %s746_s21 = scalar_lea.vmem %s745_s19, 256  ;;  %p747_p10 = scmp.lt.s32.totalorder %s193_s8, %s745_s19 }
  0x1a   : > { %p742_p6 = pnand %p740_p5, %p728_p3  ;;  %p748_p12 = scmp.lt.s32.totalorder %s746_s21, %s739_s11 }
  0x1c   : > { %p743_p7 = pneg %p742_p6  ;;  %p749_p4 = por %p748_p12, %p747_p10 }
  0x1e   : > { %p750_p13 = pnand %p749_p4, %p743_p7 }
  0x20   : > { %753 = shalt.err (!%p750_p13)
}
  0x21   : > { %663 = dma.hbm_to_vmem [thread:$0]  (!%p936_p0), %s190_s6, 128, %s193_s8, %s181_s10  }
  0x22   : > { %p198_p11 = pnand %p625_p1, %p197_p2 }
  0x23   : > { %s951_s22 = sand.u32 (!%p198_p11), 1, %s818_s13  }
  0x24   : > { %201 = sbr.rel (%p198_p11) target bundleno = 379 (0x17b), region = 32  ;;  %s626_s23 = sshll.u32 (!%p198_p11), %s951_s22, 3 }
  0x25   : > { %s204_s28 = scalar_lea.sflag (!%p198_p11), [#allocation3], %s951_s22  ;;  %s207_s29 = scalar_lea.vmem (!%p198_p11), [#allocation2], %s626_s23 }
  0x29   : > { %805 = dma.done.wait (%p912_p8), %s204_s28, 128  }
  0x2a   : > { %807 = vsyncadd (%p912_p8), %s204_s28, 4294967168  ;;  %v837_v0 = vmov 0.0   ;;  %vm838_vm0 = vmmov 0   ;;  %v839_v1 = vmov 0   ;;  %v247_v2 = vld [vmem:[%s207_s29] sm:$0xff]  ;;  %vm255_vm1 = vcmask 64512  }
  0x2b   : > { %641 = vmatprep.subr.mxu0 %v837_v0  ;;  %646 = vmatprep.subr.mxu1 %v837_v0  ;;  %s840_s30 = smov 127   ;;  %s841_s4 = smov 126   ;;  %v246_v3 = vld [vmem:[%s1016_s1] sm:$0xff]  ;;  %vm485_vm2 = vcmask 113664  }
  0x2c   : > { %643 = vmatprep.mubr.msk.f32.mxu0 %vm838_vm0, %v837_v0  ;;  %648 = vmatprep.mubr.msk.f32.mxu1 %vm838_vm0, %v837_v0  ;;  %s842_s24 = smov 120   ;;  %s843_s7 = smov 112   ;;  %v478_v4 = vld [vmem:[%s1017_s2] sm:$0xff] }
  0x2d   : > { %725 = vset.pattern.permute.xlu0 %v839_v1  ;;  %402 = vrot.lane.b32.xlu1 %v247_v2, %s841_s4  ;;  %s632_s10 = sshll.u32 %s826_s15, 7  ;;  %s237_s11 = scalar_lea.vmem [#allocation5], %s626_s23 }
  0x2e   : > { %252 = vrot.lane.b32.xlu0 %v247_v2, %s840_s30  ;;  %647 = vmatpush3.msra.mxu1 %v247_v2  ;;  %s503_s18 = sshll.u32 %s237_s11, 4  ;;  %s501_s28 = scalar_lea.hbm %s1018_s3, %s632_s10  ;;  %s504_s18 = int_to_ptr.vmem [resolvable:$true] %s503_s18 }
  0x2f   : > { %649 = vmatmul.mubr.msk.f32.vlgmr.msra.gmra.mxu1 %vm255_vm1, %v246_v3  ;;  %s488_s29 = scalar_lea.sflag [#allocation4], %s951_s22  ;;  %s754_s30 = scalar_lea.vmem %s504_s18, 128 }
  0x30   : > { %p755_p8 = scmp.ne.s32.totalorder %s504_s18, %s754_s30  ;;  %s844_s15 = smov [#allocation5]  }
  0x31   : > { %400 = vrot.lane.b32.xlu1 %v246_v3, %s843_s7  ;;  %s758_s4 = sshll.u32 %s844_s15, 4  ;;  %s759_s4 = int_to_ptr.vmem [resolvable:$false] %s758_s4 }
  0x32   : > { %249 = vrot.lane.b32.xlu0 %v246_v3, %s842_s24  ;;  %p756_p11 = pnand %p755_p8, %p916_p9  ;;  %s760_s23 = scalar_lea.vmem %s759_s4, 256 }
  0x33   : > { %p761_p0 = scmp.lt.s32.totalorder %s504_s18, %s759_s4  ;;  %p762_p1 = scmp.lt.s32.totalorder %s760_s23, %s754_s30 }
  0x34   : > { %p757_p12 = pneg %p756_p11 }
  0x35   : > { %p763_p2 = por %p762_p1, %p761_p0 }
  0x36   : > { %481 = vperm.xlu0 %725, %v478_v4  }
  0x37   : > { %p764_p3 = pnand %p763_p2, %p757_p12 }
  0x9f   : > { %v403_v6 = vpop.permute.xlu1 %402 }
  0xa0   : > { %v253_v5 = vpop.permute.xlu0 %252 }
  0xa1   : > { %642 = vmatpush3.msra.mxu0 %v253_v5 }
  0xa2   : > { %651 = vmatprep.subr.mxu0 %v837_v0 }
  0xa3   : > { %v401_v8 = vpop.permute.xlu1 %400 }
  0xa4   : > { %v250_v7 = vpop.permute.xlu0 %249 }
  0xa5   : > { %644 = vmatmul.mubr.msk.f32.vlgmr.msra.gmra.mxu0 %vm255_vm1, %v250_v7 }
  0xa6   : > { %652 = vmatpush3.msra.mxu0 %v403_v6  ;;  %653 = vmatprep.mubr.msk.f32.mxu0 %vm838_vm0, %v837_v0 }
  0xa9   : > { %654 = vmatmul.mubr.msk.f32.vlgmr.msra.gmra.mxu0 %vm255_vm1, %v401_v8 }
  0xb1   : > { %v482_v15 = vpop.permute.xlu0 %481 }
  0xef   : > { %v396_v9 = vpop.f32.mrf.mxu1 }
  0xf1   : > { %v650_v10 = vpop.f32.mrf.mxu1 }
 0x165   : > { %v324_v11 = vpop.f32.mrf.mxu0 }
 0x166   : > { %v397_v13 = vadd.f32 %v396_v9, %v324_v11 }
 0x167   : > { %v645_v12 = vpop.f32.mrf.mxu0 }
 0x169   : > { %v473_v14 = vpop.f32.mrf.mxu0 }
 0x16a   : > { %v477_v16 = vadd.f32 %v473_v14, %v397_v13 }
 0x16b   : > { %v655_v17 = vpop.f32.mrf.mxu0 }
 0x16c   : > { %v484_v18 = vadd.f32 %v482_v15, %v477_v16 }
 0x16e   : > { %486 = vst.msk [vmem:[%s237_s11] sm:$0xff] %vm485_vm2, %v484_v18 }
 0x16f   : > { %767 = shalt.err (!%p764_p3)
}
 0x170   : > { %s768_s5 = scalar_lea.hbm %s501_s28, 128  ;;  %s772_s24 = scalar_lea.hbm %s1018_s3, 256 }
 0x171   : > { %p769_p5 = scmp.ne.s32.totalorder %s501_s28, %s768_s5  ;;  %p773_p10 = scmp.lt.s32.totalorder %s501_s28, %s1018_s3 }
 0x172   : > { %p774_p4 = scmp.lt.s32.totalorder %s772_s24, %s768_s5 }
 0x173   : > { %p770_p6 = pnand %p769_p5, %p916_p9 }
 0x174   : > { %p775_p13 = por %p774_p4, %p773_p10 }
 0x175   : > { %p771_p7 = pneg %p770_p6 }
 0x177   : > { %p776_p8 = pnand %p775_p13, %p771_p7 }
 0x179   : > { %779 = shalt.err (!%p776_p8)
}
 0x17a   : > { %658 = dma.vmem_to_hbm [thread:$0]  (%p916_p9), %s504_s18, 128, %s501_s28, %s488_s29  }
 0x17b PF: > { %s515_s9 = sand.u32 1, %s814_s12   ;;  %p1024_p11 = scmp.ne.s32.totalorder %s1022_s27, 0 }
 0x17c   : > { %p1025_p12 = scmp.ge.s32.totalorder %s834_s17, 2  ;;  %s516_s10 = scalar_lea.sflag [#allocation4], %s515_s9 }
 0x17e   : > { %p665_p0 = pnand %p1025_p12, %p1024_p11 }
 0x180   : > { %p666_p1 = pneg %p665_p0 }
 0x182   : > { %809 = dma.done.wait (%p666_p1), %s516_s10, 128  }
 0x183   : > { %811 = vsyncadd (%p666_p1), %s516_s10, 4294967168  ;;  %s19_s17 = sadd.s32 1, %s834_s17   ;;  %s1026_s12 = smov %s818_s13 }
 0x184   : > { %p16_p2 = scmp.ge.s32.totalorder %s19_s17, 4   ;;  %s1027_s13 = smov %s822_s14 }
 0x185   : > { %s1028_s14 = smov %s921_s26  ;;  %s1029_s15 = smov %s830_s16 }
 0x186   : > { %s1030_s16 = smov %s1032_s20  ;;  %18 = sbr.rel (!%p16_p2) target bundleno = 6 (0x6), region = 83 }
 0x18b   :  { %521 = vsyncpa [#allocation3], 1 }
 0x18c   :  { %523 = vsyncpa [#allocation3 + $0x1], 1 }
 0x18d   :  { %524 = vsyncpa [#allocation4], 1 }
 0x18e   :  { %526 = vsyncpa [#allocation4 + $0x1], 1 }

</bundles_post_ra>
